<compile_context>
chip_gen: v7x
topology: tpu7x:2x2x1
jax: 0.10.0
libtpu: 0.0.40
codegen_flags: <defaults>
</compile_context>

<pallas_src>
import functools

import jax
import jax.numpy as jnp
from jax.experimental import pallas as pl
from jax.experimental.pallas import tpu as pltpu

_LN_EPS = 1e-5  # PyTorch nn.LayerNorm default


def _gelu_tanh(x):
    # TODO(synk): PyTorch nn.GELU() default is the exact erf-based GELU; the tanh
    # approximation is used here (tanh is a guaranteed EUP op in Mosaic). The same
    # function is used in the JAX reference, max deviation from erf-GELU ~1e-3.
    c = 0.7978845608028654  # sqrt(2/pi)
    return 0.5 * x * (1.0 + jnp.tanh(c * (x + 0.044715 * x * x * x)))


def encoder_layer_kernel(x_ref, ln1_g_ref, ln1_b_ref, wqkv_ref, wo_ref, bo_ref,
                         ln2_g_ref, ln2_b_ref, w1_ref, b1_ref, w2_ref, b2_ref,
                         o_ref, *, heads, dim_head, scale, n_tokens, batch_block):
    """One grid step == `batch_block` batch elements (batch_block * n_tokens rows)."""
    inner = heads * dim_head
    x = x_ref[...].astype(jnp.float32)                      # (rows, dim)

    # ---- PreNorm 1 (LayerNorm over features) ----
    mu = jnp.mean(x, axis=-1, keepdims=True)
    var = jnp.mean(jnp.square(x - mu), axis=-1, keepdims=True)
    xn = (x - mu) * jax.lax.rsqrt(var + _LN_EPS)
    xn = xn * ln1_g_ref[...] + ln1_b_ref[...]

    # ---- fused QKV projection: one full-width MXU matmul ----
    qkv = jnp.dot(xn, wqkv_ref[...], preferred_element_type=jnp.float32)  # (rows, 3*inner)
    q = qkv[:, :inner] * scale          # fold softmax scale into q (cheaper than scaling NxN scores)
    k = qkv[:, inner:2 * inner]
    v = qkv[:, 2 * inner:]

    # ---- attention: static loops over packed batches and heads,
    #      per-head outputs gathered lane-wise into one (rows, inner) buffer ----
    batch_outs = []
    for b in range(batch_block):
        r0 = b * n_tokens
        qb = q[r0:r0 + n_tokens, :]
        kb = k[r0:r0 + n_tokens, :]
        vb = v[r0:r0 + n_tokens, :]
        head_outs = []
        for h in range(heads):
            s = h * dim_head
            qh = qb[:, s:s + dim_head]
            kh = kb[:, s:s + dim_head]
            vh = vb[:, s:s + dim_head]
            dots = jnp.dot(qh, kh.T, preferred_element_type=jnp.float32)   # (n, n)
            dots = dots - jnp.max(dots, axis=-1, keepdims=True)            # stable softmax
            e = jnp.exp(dots)
            p = e * pl.reciprocal(jnp.sum(e, axis=-1, keepdims=True), approx=True)
            head_outs.append(jnp.dot(p, vh, preferred_element_type=jnp.float32))
        batch_outs.append(head_outs[0] if heads == 1
                          else jnp.concatenate(head_outs, axis=-1))        # (n, inner)
    attn_out = (batch_outs[0] if batch_block == 1
                else jnp.concatenate(batch_outs, axis=0))                  # (rows, inner)

    # ---- single fused output projection (+ bias) + residual ----
    x = x + jnp.dot(attn_out, wo_ref[...], preferred_element_type=jnp.float32) + bo_ref[...]

    # ---- PreNorm 2 + FeedForward (Linear -> GELU -> Linear), dropout = identity ----
    mu2 = jnp.mean(x, axis=-1, keepdims=True)
    var2 = jnp.mean(jnp.square(x - mu2), axis=-1, keepdims=True)
    xn2 = (x - mu2) * jax.lax.rsqrt(var2 + _LN_EPS)
    xn2 = xn2 * ln2_g_ref[...] + ln2_b_ref[...]

    h1 = jnp.dot(xn2, w1_ref[...], preferred_element_type=jnp.float32) + b1_ref[...]
    h1 = _gelu_tanh(h1)
    y = x + jnp.dot(h1, w2_ref[...], preferred_element_type=jnp.float32) + b2_ref[...]

    o_ref[...] = y.astype(o_ref.dtype)


def _single_layer_call(x_rows, params, *, heads, dim_head, n_tokens,
                       batch_block, num_steps):
    rows_total, dim = x_rows.shape
    rows = batch_block * n_tokens
    inner = heads * dim_head
    dim_mlp = params[7].shape[1]  # w1: (dim, dim_mlp)

    kernel = functools.partial(
        encoder_layer_kernel, heads=heads, dim_head=dim_head,
        scale=dim_head ** (-0.5), n_tokens=n_tokens, batch_block=batch_block)

    full = lambda i: (0, 0)
    return pl.pallas_call(
        kernel,
        out_shape=jax.ShapeDtypeStruct((rows_total, dim), x_rows.dtype),
        grid_spec=pltpu.PrefetchScalarGridSpec(
            num_scalar_prefetch=0,
            grid=(num_steps,),
            in_specs=[
                pl.BlockSpec((rows, dim), lambda i: (i, 0)),   # packed activation rows
                pl.BlockSpec((1, dim), full),                  # ln1 gamma
                pl.BlockSpec((1, dim), full),                  # ln1 beta
                pl.BlockSpec((dim, 3 * inner), full),          # wqkv (fused q|k|v)
                pl.BlockSpec((inner, dim), full),              # wo
                pl.BlockSpec((1, dim), full),                  # bo
                pl.BlockSpec((1, dim), full),                  # ln2 gamma
                pl.BlockSpec((1, dim), full),                  # ln2 beta
                pl.BlockSpec((dim, dim_mlp), full),            # w1
                pl.BlockSpec((1, dim_mlp), full),              # b1
                pl.BlockSpec((dim_mlp, dim), full),            # w2
                pl.BlockSpec((1, dim), full),                  # b2
            ],
            out_specs=pl.BlockSpec((rows, dim), lambda i: (i, 0)),
        ),
        compiler_params=pltpu.CompilerParams(
            dimension_semantics=("parallel",)),   # batch-row axis -> v7x megacore
    )(x_rows, *params)


def encoder_layer(x, layers_params, *, heads, dim_head, batch_block=None):
    """Applies `len(layers_params)` fused (PreNorm-Attn, PreNorm-FFN) blocks."""
    B, N, dim = x.shape
    if batch_block is None:
        # Keep >= 2 grid steps when possible (both v7x TensorCores busy) while
        # packing as many batch rows per step as that allows.
        batch_block = B // 2 if (B >= 2 and B % 2 == 0) else 1
    assert B % batch_block == 0
    num_steps = B // batch_block
    x_rows = x.reshape(B * N, dim)      # pack (batch, seq) rows -> bigger MXU M dim
    for params in layers_params:
        x_rows = _single_layer_call(x_rows, params, heads=heads, dim_head=dim_head,
                                    n_tokens=N, batch_block=batch_block,
                                    num_steps=num_steps)
    return x_rows.reshape(B, N, dim)


def encoder_layer_reference(x, pt_layers, *, heads, dim_head):
    """Pure-JAX reference mirroring the PyTorch EncoderLayer forward (PyTorch weight layout)."""
    scale = dim_head ** (-0.5)
    B, N, dim = x.shape
    inner = heads * dim_head
    for (ln1_g, ln1_b, wqkv_pt, wo_pt, bo_pt,
         ln2_g, ln2_b, w1_pt, b1_pt, w2_pt, b2_pt) in pt_layers:
        # PreNorm + Attention + residual
        mu = x.mean(-1, keepdims=True)
        var = ((x - mu) ** 2).mean(-1, keepdims=True)
        xn = (x - mu) / jnp.sqrt(var + _LN_EPS) * ln1_g + ln1_b
        qkv = xn @ wqkv_pt.T
        q, k, v = jnp.split(qkv, 3, axis=-1)
        qh = q.reshape(B, N, heads, dim_head).transpose(0, 2, 1, 3)
        kh = k.reshape(B, N, heads, dim_head).transpose(0, 2, 1, 3)
        vh = v.reshape(B, N, heads, dim_head).transpose(0, 2, 1, 3)
        dots = jnp.einsum("bhqd,bhkd->bhqk", qh, kh) * scale
        attn = jax.nn.softmax(dots, axis=-1)
        out = jnp.einsum("bhqk,bhkd->bhqd", attn, vh)
        out = out.transpose(0, 2, 1, 3).reshape(B, N, inner)
        x = x + out @ wo_pt.T + bo_pt
        # PreNorm + FeedForward + residual
        mu = x.mean(-1, keepdims=True)
        var = ((x - mu) ** 2).mean(-1, keepdims=True)
        xn = (x - mu) / jnp.sqrt(var + _LN_EPS) * ln2_g + ln2_b
        h = _gelu_tanh(xn @ w1_pt.T + b1_pt)
        x = x + h @ w2_pt.T + b2_pt
    return x


if __name__ == "__main__":
    # Small shapes consistent with the module.
    B, N = 2, 8
    dim, heads, dim_head, dim_mlp, depth = 32, 4, 16, 64, 1
    inner = heads * dim_head

    root = jax.random.PRNGKey(0)
    kx, kp = jax.random.split(root)
    x = jax.random.normal(kx, (B, N, dim), dtype=jnp.float32)

    def uni(key, shape, bound):
        return jax.random.uniform(key, shape, minval=-bound, maxval=bound,
                                  dtype=jnp.float32)

    pt_layers = []      # PyTorch layout (for the reference)
    kern_layers = []    # pre-transposed kernel layout
    for lk in jax.random.split(kp, depth):
        ks = jax.random.split(lk, 11)
        ln1_g = 1.0 + 0.1 * jax.random.normal(ks[0], (dim,), jnp.float32)
        ln1_b = 0.1 * jax.random.normal(ks[1], (dim,), jnp.float32)
        ln2_g = 1.0 + 0.1 * jax.random.normal(ks[2], (dim,), jnp.float32)
        ln2_b = 0.1 * jax.random.normal(ks[3], (dim,), jnp.float32)
        wqkv_pt = uni(ks[4], (3 * inner, dim), dim ** -0.5)     # to_qkv.weight (bias=False)
        wo_pt = uni(ks[5], (dim, inner), inner ** -0.5)         # to_out[0].weight
        bo_pt = uni(ks[6], (dim,), inner ** -0.5)               # to_out[0].bias
        w1_pt = uni(ks[7], (dim_mlp, dim), dim ** -0.5)         # ff Linear1 weight
        b1_pt = uni(ks[8], (dim_mlp,), dim ** -0.5)             # ff Linear1 bias
        w2_pt = uni(ks[9], (dim, dim_mlp), dim_mlp ** -0.5)     # ff Linear2 weight
        b2_pt = uni(ks[10], (dim,), dim_mlp ** -0.5)            # ff Linear2 bias

        pt_layers.append((ln1_g, ln1_b, wqkv_pt, wo_pt, bo_pt,
                          ln2_g, ln2_b, w1_pt, b1_pt, w2_pt, b2_pt))
        kern_layers.append((ln1_g.reshape(1, dim), ln1_b.reshape(1, dim),
                            wqkv_pt.T, wo_pt.T, bo_pt.reshape(1, dim),
                            ln2_g.reshape(1, dim), ln2_b.reshape(1, dim),
                            w1_pt.T, b1_pt.reshape(1, dim_mlp),
                            w2_pt.T, b2_pt.reshape(1, dim)))

    out = encoder_layer(x, kern_layers, heads=heads, dim_head=dim_head)
    out = jax.block_until_ready(out)

    ref = encoder_layer_reference(x, pt_layers, heads=heads, dim_head=dim_head)
    assert out.shape == (B, N, dim)
    # tolerance accounts for pl.reciprocal(approx=True) in the softmax normalization
    assert jnp.allclose(out, ref, atol=1e-2, rtol=1e-2), "mismatch vs reference"

    print("KERNEL_OK")
</pallas_src>

<mosaic_0001>
module attributes {stable_mosaic.version = 11 : i64} {
  func.func @encoder_layer_kernel(%arg0: i32, %arg1: memref<8x32xf32, #tpu.memory_space<vmem>>, %arg2: memref<1x32xf32, #tpu.memory_space<vmem>>, %arg3: memref<1x32xf32, #tpu.memory_space<vmem>>, %arg4: memref<32x192xf32, #tpu.memory_space<vmem>>, %arg5: memref<64x32xf32, #tpu.memory_space<vmem>>, %arg6: memref<1x32xf32, #tpu.memory_space<vmem>>, %arg7: memref<1x32xf32, #tpu.memory_space<vmem>>, %arg8: memref<1x32xf32, #tpu.memory_space<vmem>>, %arg9: memref<32x64xf32, #tpu.memory_space<vmem>>, %arg10: memref<1x64xf32, #tpu.memory_space<vmem>>, %arg11: memref<64x32xf32, #tpu.memory_space<vmem>>, %arg12: memref<1x32xf32, #tpu.memory_space<vmem>>, %arg13: memref<8x32xf32, #tpu.memory_space<vmem>>) attributes {dimension_semantics = [#tpu.dimension_semantics<parallel>], iteration_bounds = array<i64: 2>, scalar_prefetch = 0 : i64, scratch_operands = 0 : i64, tpu.core_type = #tpu.core_type<tc>, window_params = [{transform_indices = @transform_0, window_bounds = array<i64: 8, 32>}, {pipeline_mode = #tpu.pipeline_mode<synchronous>, transform_indices = @transform_1, window_bounds = array<i64: 1, 32>}, {pipeline_mode = #tpu.pipeline_mode<synchronous>, transform_indices = @transform_2, window_bounds = array<i64: 1, 32>}, {pipeline_mode = #tpu.pipeline_mode<synchronous>, transform_indices = @transform_3, window_bounds = array<i64: 32, 192>}, {pipeline_mode = #tpu.pipeline_mode<synchronous>, transform_indices = @transform_4, window_bounds = array<i64: 64, 32>}, {pipeline_mode = #tpu.pipeline_mode<synchronous>, transform_indices = @transform_5, window_bounds = array<i64: 1, 32>}, {pipeline_mode = #tpu.pipeline_mode<synchronous>, transform_indices = @transform_6, window_bounds = array<i64: 1, 32>}, {pipeline_mode = #tpu.pipeline_mode<synchronous>, transform_indices = @transform_7, window_bounds = array<i64: 1, 32>}, {pipeline_mode = #tpu.pipeline_mode<synchronous>, transform_indices = @transform_8, window_bounds = array<i64: 32, 64>}, {pipeline_mode = #tpu.pipeline_mode<synchronous>, transform_indices = @transform_9, window_bounds = array<i64: 1, 64>}, {pipeline_mode = #tpu.pipeline_mode<synchronous>, transform_indices = @transform_10, window_bounds = array<i64: 64, 32>}, {pipeline_mode = #tpu.pipeline_mode<synchronous>, transform_indices = @transform_11, window_bounds = array<i64: 1, 32>}, {transform_indices = @transform_12, window_bounds = array<i64: 8, 32>}]} {
    %c0 = arith.constant 0 : index
    %c0_0 = arith.constant 0 : index
    %0 = vector.load %arg1[%c0, %c0_0] : memref<8x32xf32, #tpu.memory_space<vmem>>, vector<8x32xf32>
    %cst = arith.constant dense<0.000000e+00> : vector<8xf32>
    %1 = vector.multi_reduction <add>, %0, %cst [1] : vector<8x32xf32> to vector<8xf32>
    %2 = vector.shape_cast %1 : vector<8xf32> to vector<8x1xf32>
    %cst_1 = arith.constant 3.200000e+01 : f32
    %3 = vector.broadcast %cst_1 : f32 to vector<8x1xf32>
    %4 = arith.divf %2, %3 : vector<8x1xf32>
    %5 = vector.broadcast %4 : vector<8x1xf32> to vector<8x32xf32>
    %6 = arith.subf %0, %5 : vector<8x32xf32>
    %7 = arith.mulf %6, %6 : vector<8x32xf32>
    %cst_2 = arith.constant dense<0.000000e+00> : vector<8xf32>
    %8 = vector.multi_reduction <add>, %7, %cst_2 [1] : vector<8x32xf32> to vector<8xf32>
    %9 = vector.shape_cast %8 : vector<8xf32> to vector<8x1xf32>
    %cst_3 = arith.constant 3.200000e+01 : f32
    %10 = vector.broadcast %cst_3 : f32 to vector<8x1xf32>
    %11 = arith.divf %9, %10 : vector<8x1xf32>
    %12 = vector.broadcast %4 : vector<8x1xf32> to vector<8x32xf32>
    %13 = arith.subf %0, %12 : vector<8x32xf32>
    %cst_4 = arith.constant 9.99999974E-6 : f32
    %14 = vector.broadcast %cst_4 : f32 to vector<8x1xf32>
    %15 = arith.addf %11, %14 : vector<8x1xf32>
    %16 = math.rsqrt %15 : vector<8x1xf32>
    %17 = vector.broadcast %16 : vector<8x1xf32> to vector<8x32xf32>
    %18 = arith.mulf %13, %17 : vector<8x32xf32>
    %c0_5 = arith.constant 0 : index
    %c0_6 = arith.constant 0 : index
    %19 = vector.load %arg2[%c0_5, %c0_6] : memref<1x32xf32, #tpu.memory_space<vmem>>, vector<1x32xf32>
    %20 = vector.broadcast %19 : vector<1x32xf32> to vector<8x32xf32>
    %21 = arith.mulf %18, %20 : vector<8x32xf32>
    %c0_7 = arith.constant 0 : index
    %c0_8 = arith.constant 0 : index
    %22 = vector.load %arg3[%c0_7, %c0_8] : memref<1x32xf32, #tpu.memory_space<vmem>>, vector<1x32xf32>
    %23 = vector.broadcast %22 : vector<1x32xf32> to vector<8x32xf32>
    %24 = arith.addf %21, %23 : vector<8x32xf32>
    %c0_9 = arith.constant 0 : index
    %c0_10 = arith.constant 0 : index
    %25 = vector.load %arg4[%c0_9, %c0_10] : memref<32x192xf32, #tpu.memory_space<vmem>>, vector<32x192xf32>
    %cst_11 = arith.constant dense<0.000000e+00> : vector<8x192xf32>
    %26 = tpu.matmul %24, %25, %cst_11 {dimension_numbers = #tpu.dot_dimension_numbers<[1], [0], [0], [1], [0, 0, 1, 1], [], []>} : vector<8x32xf32>, vector<32x192xf32>, vector<8x192xf32> -> vector<8x192xf32>
    %27 = vector.extract_strided_slice %26 {offsets = [0, 0], sizes = [8, 64], strides = [1, 1]} : vector<8x192xf32> to vector<8x64xf32>
    %cst_12 = arith.constant 2.500000e-01 : f32
    %28 = vector.broadcast %cst_12 : f32 to vector<8x64xf32>
    %29 = arith.mulf %27, %28 : vector<8x64xf32>
    %30 = vector.extract_strided_slice %26 {offsets = [0, 64], sizes = [8, 64], strides = [1, 1]} : vector<8x192xf32> to vector<8x64xf32>
    %31 = vector.extract_strided_slice %26 {offsets = [0, 128], sizes = [8, 64], strides = [1, 1]} : vector<8x192xf32> to vector<8x64xf32>
    %32 = vector.extract_strided_slice %29 {offsets = [0, 0], sizes = [8, 16], strides = [1, 1]} : vector<8x64xf32> to vector<8x16xf32>
    %33 = vector.extract_strided_slice %30 {offsets = [0, 0], sizes = [8, 16], strides = [1, 1]} : vector<8x64xf32> to vector<8x16xf32>
    %34 = vector.extract_strided_slice %31 {offsets = [0, 0], sizes = [8, 16], strides = [1, 1]} : vector<8x64xf32> to vector<8x16xf32>
    %35 = tpu.transpose %33, [1, 0] : vector<8x16xf32> -> vector<16x8xf32>
    %cst_13 = arith.constant dense<0.000000e+00> : vector<8x8xf32>
    %36 = tpu.matmul %32, %35, %cst_13 {dimension_numbers = #tpu.dot_dimension_numbers<[1], [0], [0], [1], [0, 0, 1, 1], [], []>} : vector<8x16xf32>, vector<16x8xf32>, vector<8x8xf32> -> vector<8x8xf32>
    %cst_14 = arith.constant dense<0xFF800000> : vector<8xf32>
    %37 = vector.multi_reduction <maximumf>, %36, %cst_14 [1] : vector<8x8xf32> to vector<8xf32>
    %38 = vector.shape_cast %37 : vector<8xf32> to vector<8x1xf32>
    %39 = vector.broadcast %38 : vector<8x1xf32> to vector<8x8xf32>
    %40 = arith.subf %36, %39 : vector<8x8xf32>
    %41 = math.exp %40 : vector<8x8xf32>
    %cst_15 = arith.constant dense<0.000000e+00> : vector<8xf32>
    %42 = vector.multi_reduction <add>, %41, %cst_15 [1] : vector<8x8xf32> to vector<8xf32>
    %43 = vector.shape_cast %42 : vector<8xf32> to vector<8x1xf32>
    %44 = tpu.reciprocal %43 {approx = true} : vector<8x1xf32> -> vector<8x1xf32>
    %45 = vector.broadcast %44 : vector<8x1xf32> to vector<8x8xf32>
    %46 = arith.mulf %41, %45 : vector<8x8xf32>
    %cst_16 = arith.constant dense<0.000000e+00> : vector<8x16xf32>
    %47 = tpu.matmul %46, %34, %cst_16 {dimension_numbers = #tpu.dot_dimension_numbers<[1], [0], [0], [1], [0, 0, 1, 1], [], []>} : vector<8x8xf32>, vector<8x16xf32>, vector<8x16xf32> -> vector<8x16xf32>
    %48 = vector.extract_strided_slice %29 {offsets = [0, 16], sizes = [8, 16], strides = [1, 1]} : vector<8x64xf32> to vector<8x16xf32>
    %49 = vector.extract_strided_slice %30 {offsets = [0, 16], sizes = [8, 16], strides = [1, 1]} : vector<8x64xf32> to vector<8x16xf32>
    %50 = vector.extract_strided_slice %31 {offsets = [0, 16], sizes = [8, 16], strides = [1, 1]} : vector<8x64xf32> to vector<8x16xf32>
    %51 = tpu.transpose %49, [1, 0] : vector<8x16xf32> -> vector<16x8xf32>
    %cst_17 = arith.constant dense<0.000000e+00> : vector<8x8xf32>
    %52 = tpu.matmul %48, %51, %cst_17 {dimension_numbers = #tpu.dot_dimension_numbers<[1], [0], [0], [1], [0, 0, 1, 1], [], []>} : vector<8x16xf32>, vector<16x8xf32>, vector<8x8xf32> -> vector<8x8xf32>
    %cst_18 = arith.constant dense<0xFF800000> : vector<8xf32>
    %53 = vector.multi_reduction <maximumf>, %52, %cst_18 [1] : vector<8x8xf32> to vector<8xf32>
    %54 = vector.shape_cast %53 : vector<8xf32> to vector<8x1xf32>
    %55 = vector.broadcast %54 : vector<8x1xf32> to vector<8x8xf32>
    %56 = arith.subf %52, %55 : vector<8x8xf32>
    %57 = math.exp %56 : vector<8x8xf32>
    %cst_19 = arith.constant dense<0.000000e+00> : vector<8xf32>
    %58 = vector.multi_reduction <add>, %57, %cst_19 [1] : vector<8x8xf32> to vector<8xf32>
    %59 = vector.shape_cast %58 : vector<8xf32> to vector<8x1xf32>
    %60 = tpu.reciprocal %59 {approx = true} : vector<8x1xf32> -> vector<8x1xf32>
    %61 = vector.broadcast %60 : vector<8x1xf32> to vector<8x8xf32>
    %62 = arith.mulf %57, %61 : vector<8x8xf32>
    %cst_20 = arith.constant dense<0.000000e+00> : vector<8x16xf32>
    %63 = tpu.matmul %62, %50, %cst_20 {dimension_numbers = #tpu.dot_dimension_numbers<[1], [0], [0], [1], [0, 0, 1, 1], [], []>} : vector<8x8xf32>, vector<8x16xf32>, vector<8x16xf32> -> vector<8x16xf32>
    %64 = vector.extract_strided_slice %29 {offsets = [0, 32], sizes = [8, 16], strides = [1, 1]} : vector<8x64xf32> to vector<8x16xf32>
    %65 = vector.extract_strided_slice %30 {offsets = [0, 32], sizes = [8, 16], strides = [1, 1]} : vector<8x64xf32> to vector<8x16xf32>
    %66 = vector.extract_strided_slice %31 {offsets = [0, 32], sizes = [8, 16], strides = [1, 1]} : vector<8x64xf32> to vector<8x16xf32>
    %67 = tpu.transpose %65, [1, 0] : vector<8x16xf32> -> vector<16x8xf32>
    %cst_21 = arith.constant dense<0.000000e+00> : vector<8x8xf32>
    %68 = tpu.matmul %64, %67, %cst_21 {dimension_numbers = #tpu.dot_dimension_numbers<[1], [0], [0], [1], [0, 0, 1, 1], [], []>} : vector<8x16xf32>, vector<16x8xf32>, vector<8x8xf32> -> vector<8x8xf32>
    %cst_22 = arith.constant dense<0xFF800000> : vector<8xf32>
    %69 = vector.multi_reduction <maximumf>, %68, %cst_22 [1] : vector<8x8xf32> to vector<8xf32>
    %70 = vector.shape_cast %69 : vector<8xf32> to vector<8x1xf32>
    %71 = vector.broadcast %70 : vector<8x1xf32> to vector<8x8xf32>
    %72 = arith.subf %68, %71 : vector<8x8xf32>
    %73 = math.exp %72 : vector<8x8xf32>
    %cst_23 = arith.constant dense<0.000000e+00> : vector<8xf32>
    %74 = vector.multi_reduction <add>, %73, %cst_23 [1] : vector<8x8xf32> to vector<8xf32>
    %75 = vector.shape_cast %74 : vector<8xf32> to vector<8x1xf32>
    %76 = tpu.reciprocal %75 {approx = true} : vector<8x1xf32> -> vector<8x1xf32>
    %77 = vector.broadcast %76 : vector<8x1xf32> to vector<8x8xf32>
    %78 = arith.mulf %73, %77 : vector<8x8xf32>
    %cst_24 = arith.constant dense<0.000000e+00> : vector<8x16xf32>
    %79 = tpu.matmul %78, %66, %cst_24 {dimension_numbers = #tpu.dot_dimension_numbers<[1], [0], [0], [1], [0, 0, 1, 1], [], []>} : vector<8x8xf32>, vector<8x16xf32>, vector<8x16xf32> -> vector<8x16xf32>
    %80 = vector.extract_strided_slice %29 {offsets = [0, 48], sizes = [8, 16], strides = [1, 1]} : vector<8x64xf32> to vector<8x16xf32>
    %81 = vector.extract_strided_slice %30 {offsets = [0, 48], sizes = [8, 16], strides = [1, 1]} : vector<8x64xf32> to vector<8x16xf32>
    %82 = vector.extract_strided_slice %31 {offsets = [0, 48], sizes = [8, 16], strides = [1, 1]} : vector<8x64xf32> to vector<8x16xf32>
    %83 = tpu.transpose %81, [1, 0] : vector<8x16xf32> -> vector<16x8xf32>
    %cst_25 = arith.constant dense<0.000000e+00> : vector<8x8xf32>
    %84 = tpu.matmul %80, %83, %cst_25 {dimension_numbers = #tpu.dot_dimension_numbers<[1], [0], [0], [1], [0, 0, 1, 1], [], []>} : vector<8x16xf32>, vector<16x8xf32>, vector<8x8xf32> -> vector<8x8xf32>
    %cst_26 = arith.constant dense<0xFF800000> : vector<8xf32>
    %85 = vector.multi_reduction <maximumf>, %84, %cst_26 [1] : vector<8x8xf32> to vector<8xf32>
    %86 = vector.shape_cast %85 : vector<8xf32> to vector<8x1xf32>
    %87 = vector.broadcast %86 : vector<8x1xf32> to vector<8x8xf32>
    %88 = arith.subf %84, %87 : vector<8x8xf32>
    %89 = math.exp %88 : vector<8x8xf32>
    %cst_27 = arith.constant dense<0.000000e+00> : vector<8xf32>
    %90 = vector.multi_reduction <add>, %89, %cst_27 [1] : vector<8x8xf32> to vector<8xf32>
    %91 = vector.shape_cast %90 : vector<8xf32> to vector<8x1xf32>
    %92 = tpu.reciprocal %91 {approx = true} : vector<8x1xf32> -> vector<8x1xf32>
    %93 = vector.broadcast %92 : vector<8x1xf32> to vector<8x8xf32>
    %94 = arith.mulf %89, %93 : vector<8x8xf32>
    %cst_28 = arith.constant dense<0.000000e+00> : vector<8x16xf32>
    %95 = tpu.matmul %94, %82, %cst_28 {dimension_numbers = #tpu.dot_dimension_numbers<[1], [0], [0], [1], [0, 0, 1, 1], [], []>} : vector<8x8xf32>, vector<8x16xf32>, vector<8x16xf32> -> vector<8x16xf32>
    %96 = tpu.concatenate %47, %63, %79, %95 in 1 : vector<8x16xf32>, vector<8x16xf32>, vector<8x16xf32>, vector<8x16xf32> -> vector<8x64xf32>
    %c0_29 = arith.constant 0 : index
    %c0_30 = arith.constant 0 : index
    %97 = vector.load %arg5[%c0_29, %c0_30] : memref<64x32xf32, #tpu.memory_space<vmem>>, vector<64x32xf32>
    %cst_31 = arith.constant dense<0.000000e+00> : vector<8x32xf32>
    %98 = tpu.matmul %96, %97, %cst_31 {dimension_numbers = #tpu.dot_dimension_numbers<[1], [0], [0], [1], [0, 0, 1, 1], [], []>} : vector<8x64xf32>, vector<64x32xf32>, vector<8x32xf32> -> vector<8x32xf32>
    %99 = arith.addf %0, %98 : vector<8x32xf32>
    %c0_32 = arith.constant 0 : index
    %c0_33 = arith.constant 0 : index
    %100 = vector.load %arg6[%c0_32, %c0_33] : memref<1x32xf32, #tpu.memory_space<vmem>>, vector<1x32xf32>
    %101 = vector.broadcast %100 : vector<1x32xf32> to vector<8x32xf32>
    %102 = arith.addf %99, %101 : vector<8x32xf32>
    %cst_34 = arith.constant dense<0.000000e+00> : vector<8xf32>
    %103 = vector.multi_reduction <add>, %102, %cst_34 [1] : vector<8x32xf32> to vector<8xf32>
    %104 = vector.shape_cast %103 : vector<8xf32> to vector<8x1xf32>
    %cst_35 = arith.constant 3.200000e+01 : f32
    %105 = vector.broadcast %cst_35 : f32 to vector<8x1xf32>
    %106 = arith.divf %104, %105 : vector<8x1xf32>
    %107 = vector.broadcast %106 : vector<8x1xf32> to vector<8x32xf32>
    %108 = arith.subf %102, %107 : vector<8x32xf32>
    %109 = arith.mulf %108, %108 : vector<8x32xf32>
    %cst_36 = arith.constant dense<0.000000e+00> : vector<8xf32>
    %110 = vector.multi_reduction <add>, %109, %cst_36 [1] : vector<8x32xf32> to vector<8xf32>
    %111 = vector.shape_cast %110 : vector<8xf32> to vector<8x1xf32>
    %cst_37 = arith.constant 3.200000e+01 : f32
    %112 = vector.broadcast %cst_37 : f32 to vector<8x1xf32>
    %113 = arith.divf %111, %112 : vector<8x1xf32>
    %114 = vector.broadcast %106 : vector<8x1xf32> to vector<8x32xf32>
    %115 = arith.subf %102, %114 : vector<8x32xf32>
    %cst_38 = arith.constant 9.99999974E-6 : f32
    %116 = vector.broadcast %cst_38 : f32 to vector<8x1xf32>
    %117 = arith.addf %113, %116 : vector<8x1xf32>
    %118 = math.rsqrt %117 : vector<8x1xf32>
    %119 = vector.broadcast %118 : vector<8x1xf32> to vector<8x32xf32>
    %120 = arith.mulf %115, %119 : vector<8x32xf32>
    %c0_39 = arith.constant 0 : index
    %c0_40 = arith.constant 0 : index
    %121 = vector.load %arg7[%c0_39, %c0_40] : memref<1x32xf32, #tpu.memory_space<vmem>>, vector<1x32xf32>
    %122 = vector.broadcast %121 : vector<1x32xf32> to vector<8x32xf32>
    %123 = arith.mulf %120, %122 : vector<8x32xf32>
    %c0_41 = arith.constant 0 : index
    %c0_42 = arith.constant 0 : index
    %124 = vector.load %arg8[%c0_41, %c0_42] : memref<1x32xf32, #tpu.memory_space<vmem>>, vector<1x32xf32>
    %125 = vector.broadcast %124 : vector<1x32xf32> to vector<8x32xf32>
    %126 = arith.addf %123, %125 : vector<8x32xf32>
    %c0_43 = arith.constant 0 : index
    %c0_44 = arith.constant 0 : index
    %127 = vector.load %arg9[%c0_43, %c0_44] : memref<32x64xf32, #tpu.memory_space<vmem>>, vector<32x64xf32>
    %cst_45 = arith.constant dense<0.000000e+00> : vector<8x64xf32>
    %128 = tpu.matmul %126, %127, %cst_45 {dimension_numbers = #tpu.dot_dimension_numbers<[1], [0], [0], [1], [0, 0, 1, 1], [], []>} : vector<8x32xf32>, vector<32x64xf32>, vector<8x64xf32> -> vector<8x64xf32>
    %c0_46 = arith.constant 0 : index
    %c0_47 = arith.constant 0 : index
    %129 = vector.load %arg10[%c0_46, %c0_47] : memref<1x64xf32, #tpu.memory_space<vmem>>, vector<1x64xf32>
    %130 = vector.broadcast %129 : vector<1x64xf32> to vector<8x64xf32>
    %131 = arith.addf %128, %130 : vector<8x64xf32>
    %cst_48 = arith.constant 5.000000e-01 : f32
    %132 = vector.broadcast %cst_48 : f32 to vector<8x64xf32>
    %133 = arith.mulf %132, %131 : vector<8x64xf32>
    %cst_49 = arith.constant 4.471500e-02 : f32
    %134 = vector.broadcast %cst_49 : f32 to vector<8x64xf32>
    %135 = arith.mulf %134, %131 : vector<8x64xf32>
    %136 = arith.mulf %135, %131 : vector<8x64xf32>
    %137 = arith.mulf %136, %131 : vector<8x64xf32>
    %138 = arith.addf %131, %137 : vector<8x64xf32>
    %cst_50 = arith.constant 0.797884583 : f32
    %139 = vector.broadcast %cst_50 : f32 to vector<8x64xf32>
    %140 = arith.mulf %139, %138 : vector<8x64xf32>
    %141 = math.tanh %140 : vector<8x64xf32>
    %cst_51 = arith.constant 1.000000e+00 : f32
    %142 = vector.broadcast %cst_51 : f32 to vector<8x64xf32>
    %143 = arith.addf %142, %141 : vector<8x64xf32>
    %144 = arith.mulf %133, %143 : vector<8x64xf32>
    %c0_52 = arith.constant 0 : index
    %c0_53 = arith.constant 0 : index
    %145 = vector.load %arg11[%c0_52, %c0_53] : memref<64x32xf32, #tpu.memory_space<vmem>>, vector<64x32xf32>
    %cst_54 = arith.constant dense<0.000000e+00> : vector<8x32xf32>
    %146 = tpu.matmul %144, %145, %cst_54 {dimension_numbers = #tpu.dot_dimension_numbers<[1], [0], [0], [1], [0, 0, 1, 1], [], []>} : vector<8x64xf32>, vector<64x32xf32>, vector<8x32xf32> -> vector<8x32xf32>
    %147 = arith.addf %102, %146 : vector<8x32xf32>
    %c0_55 = arith.constant 0 : index
    %c0_56 = arith.constant 0 : index
    %148 = vector.load %arg12[%c0_55, %c0_56] : memref<1x32xf32, #tpu.memory_space<vmem>>, vector<1x32xf32>
    %149 = vector.broadcast %148 : vector<1x32xf32> to vector<8x32xf32>
    %150 = arith.addf %147, %149 : vector<8x32xf32>
    %c0_57 = arith.constant 0 : index
    %c0_58 = arith.constant 0 : index
    %151 = vector.load %arg13[%c0_57, %c0_58] : memref<8x32xf32, #tpu.memory_space<vmem>>, vector<8x32xf32>
    tpu.vector_store %arg13[%c0_57, %c0_58], %150 {strides = array<i32>} : memref<8x32xf32, #tpu.memory_space<vmem>>, vector<8x32xf32>,
    return
  }
  func.func @transform_0(%arg0: i32) -> (i32, i32) {
    %c0_i32 = arith.constant 0 : i32
    %c0_i32_0 = arith.constant 0 : i32
    return %arg0, %c0_i32 : i32, i32
  }
  func.func @transform_1(%arg0: i32) -> (i32, i32) {
    %c0_i32 = arith.constant 0 : i32
    %c0_i32_0 = arith.constant 0 : i32
    %c0_i32_1 = arith.constant 0 : i32
    return %c0_i32, %c0_i32_0 : i32, i32
  }
  func.func @transform_2(%arg0: i32) -> (i32, i32) {
    %c0_i32 = arith.constant 0 : i32
    %c0_i32_0 = arith.constant 0 : i32
    %c0_i32_1 = arith.constant 0 : i32
    return %c0_i32, %c0_i32_0 : i32, i32
  }
  func.func @transform_3(%arg0: i32) -> (i32, i32) {
    %c0_i32 = arith.constant 0 : i32
    %c0_i32_0 = arith.constant 0 : i32
    %c0_i32_1 = arith.constant 0 : i32
    return %c0_i32, %c0_i32_0 : i32, i32
  }
  func.func @transform_4(%arg0: i32) -> (i32, i32) {
    %c0_i32 = arith.constant 0 : i32
    %c0_i32_0 = arith.constant 0 : i32
    %c0_i32_1 = arith.constant 0 : i32
    return %c0_i32, %c0_i32_0 : i32, i32
  }
  func.func @transform_5(%arg0: i32) -> (i32, i32) {
    %c0_i32 = arith.constant 0 : i32
    %c0_i32_0 = arith.constant 0 : i32
    %c0_i32_1 = arith.constant 0 : i32
    return %c0_i32, %c0_i32_0 : i32, i32
  }
  func.func @transform_6(%arg0: i32) -> (i32, i32) {
    %c0_i32 = arith.constant 0 : i32
    %c0_i32_0 = arith.constant 0 : i32
    %c0_i32_1 = arith.constant 0 : i32
    return %c0_i32, %c0_i32_0 : i32, i32
  }
  func.func @transform_7(%arg0: i32) -> (i32, i32) {
    %c0_i32 = arith.constant 0 : i32
    %c0_i32_0 = arith.constant 0 : i32
    %c0_i32_1 = arith.constant 0 : i32
    return %c0_i32, %c0_i32_0 : i32, i32
  }
  func.func @transform_8(%arg0: i32) -> (i32, i32) {
    %c0_i32 = arith.constant 0 : i32
    %c0_i32_0 = arith.constant 0 : i32
    %c0_i32_1 = arith.constant 0 : i32
    return %c0_i32, %c0_i32_0 : i32, i32
  }
  func.func @transform_9(%arg0: i32) -> (i32, i32) {
    %c0_i32 = arith.constant 0 : i32
    %c0_i32_0 = arith.constant 0 : i32
    %c0_i32_1 = arith.constant 0 : i32
    return %c0_i32, %c0_i32_0 : i32, i32
  }
  func.func @transform_10(%arg0: i32) -> (i32, i32) {
    %c0_i32 = arith.constant 0 : i32
    %c0_i32_0 = arith.constant 0 : i32
    %c0_i32_1 = arith.constant 0 : i32
    return %c0_i32, %c0_i32_0 : i32, i32
  }
  func.func @transform_11(%arg0: i32) -> (i32, i32) {
    %c0_i32 = arith.constant 0 : i32
    %c0_i32_0 = arith.constant 0 : i32
    %c0_i32_1 = arith.constant 0 : i32
    return %c0_i32, %c0_i32_0 : i32, i32
  }
  func.func @transform_12(%arg0: i32) -> (i32, i32) {
    %c0_i32 = arith.constant 0 : i32
    %c0_i32_0 = arith.constant 0 : i32
    return %arg0, %c0_i32 : i32, i32
  }
}

</mosaic_0001>

<bundles_post_ra>
// kernel: tpu_custom_call.1
= control target key start
LH: loop header
LB: loop body
LE: loop exit
PB: predicated region body
PF: predicated region fallthrough
CT: control target
= control target key end

     0   :  { %s2292_s0 = inlined_call_operand.vmem [shape: f32[16,32], index: 0, kind: input, shape index: {}]   ;;  %s2293_s1 = inlined_call_operand.vmem [shape: f32[1,32], index: 1, kind: input, shape index: {}]   ;;  %s2294_s2 = inlined_call_operand.vmem [shape: f32[1,32], index: 2, kind: input, shape index: {}]   ;;  %s2295_s3 = inlined_call_operand.vmem [shape: f32[32,192], index: 3, kind: input, shape index: {}]   ;;  %s2296_s4 = inlined_call_operand.vmem [shape: f32[64,32], index: 4, kind: input, shape index: {}]   ;;  %s2297_s5 = inlined_call_operand.vmem [shape: f32[1,32], index: 5, kind: input, shape index: {}]   ;;  %s2298_s6 = inlined_call_operand.vmem [shape: f32[1,32], index: 6, kind: input, shape index: {}]   ;;  %s2299_s7 = inlined_call_operand.vmem [shape: f32[1,32], index: 7, kind: input, shape index: {}]   ;;  %s2300_s8 = inlined_call_operand.vmem [shape: f32[32,64], index: 8, kind: input, shape index: {}]   ;;  %s2301_s9 = inlined_call_operand.vmem [shape: f32[1,64], index: 9, kind: input, shape index: {}]   ;;  %s2302_s10 = inlined_call_operand.vmem [shape: f32[64,32], index: 10, kind: input, shape index: {}]   ;;  %s2303_s11 = inlined_call_operand.vmem [shape: f32[1,32], index: 11, kind: input, shape index: {}]   ;;  %s2304_s12 = inlined_call_operand.hbm [shape: f32[16,32], index: 12, kind: output, shape index: {}]  }
   0x1   :  { %2305 = sst [smem:[#allocation6_spill]] %s2292_s0 }
   0x2   :  { %17 = vsyncpa [#allocation3], 0 }
   0x3   :  { %19 = vsyncpa [#allocation3 + $0x1], 0  ;;  %s1987_s21 = smov 0   ;;  %s1989_s22 = smov 0  }
   0x4   :  { %s1991_s23 = smov 0   ;;  %s1993_s24 = smov 0  }
   0x5 LB: > { %s2008_s25 = sadd.s32 4294967295, %s1909_s24   ;;  %s1577_s26 = sadd.s32 4294967294, %s1909_s24   ;;  %s1909_s24 = sphi %s1993_s24, %s2314_s24   ;;  %s1905_s23 = sphi %s1991_s23, %s2313_s23   ;;  %s1901_s22 = sphi %s1989_s22, %s2312_s22   ;;  %s1897_s21 = sphi %s1987_s21, %s2311_s21  }
   0x6   : > { %s2012_s27 = sadd.s32 1, %s1909_s24   ;;  %s289_s28 = sadd.s32 1, %s1905_s23 }
   0x7   : > { %s286_s29 = ssub.s32 %s1909_s24, %s2012_s27  ;;  %p299_p0 = scmp.ne.s32.totalorder %s1905_s23, %s1901_s22 }
   0x8   : > { %p287_p1 = scmp.eq.s32.totalorder %s286_s29, 0  ;;  %p300_p2 = scmp.eq.s32.totalorder %s2008_s25, 1 }
   0x9   : > { %p305_p3 = scmp.ne.s32.totalorder %s1901_s22, %s1897_s21  ;;  %p306_p4 = scmp.eq.s32.totalorder %s1577_s26, 1 }
   0xa   : > { %s2023_s30 = scalar_select %p287_p1, %s1905_s23, %s289_s28  }
   0xb   : > { %p2025_p5 = por %p300_p2, %p299_p0  ;;  %p2029_p6 = por %p306_p4, %p305_p3 }
   0xc   : > { %2306 = sst [smem:[#allocation5_spill]] %s2023_s30  ;;  %p1580_p7 = scmp.ge.s32.totalorder %s1909_s24, 1 }
   0xd   : > { %p364_p8 = scmp.lt.s32.totalorder %s1909_s24, 3 }
   0xf   : > { %p365_p9 = pnand %p1580_p7, %p364_p8 }
  0x10   : > { %p405_p10 = scmp.lt.s32.totalorder (!%p365_p9), %s2008_s25, 1  ;;  %vm410_vm0 = vcmask (!%p365_p9), 261120   ;;  %s2309_s0 = sld [smem:[#allocation6_spill]] (!%p365_p9)  ;;  %v442_v7 = vld [vmem:[%s2295_s3 + $0x8] sm:$0xff] (!%p365_p9)  ;;  %v444_v8 = vld [vmem:[%s2295_s3 + $0x18] sm:$0xff] (!%p365_p9)  ;;  %v441_v9 = vld [vmem:[%s2295_s3] sm:$0xff] (!%p365_p9) }
  0x11   : > { %368 = sbr.rel (%p365_p9) target bundleno = 2541 (0x9ed), region = 68  ;;  %v1738_v10 = vpack.c.bf16 (!%p365_p9), %v444_v8, %v442_v7  ;;  %v443_v11 = vld [vmem:[%s2295_s3 + $0x10] sm:$0xff] (!%p365_p9)  ;;  %v446_v12 = vld [vmem:[%s2295_s3 + $0x28] sm:$0xff] (!%p365_p9)  ;;  %v448_v13 = vld [vmem:[%s2295_s3 + $0x38] sm:$0xff] (!%p365_p9)  ;;  %v1911_v14 = vmov (!%p365_p9), 0.0   ;;  %vm1912_vm1 = vmmov (!%p365_p9), 0  }
  0x12   : > { %516 = vmatprep.mubr.f32.mxu0 (!%p365_p9), %v1911_v14  ;;  %1654 = vmatprep.subr.mxu1 (!%p365_p9), %v1911_v14  ;;  %v1740_v15 = vpack.c.bf16 (!%p365_p9), %v443_v11, %v441_v9  ;;  %v1742_v16 = vpack.c.bf16 (!%p365_p9), %v448_v13, %v446_v12  ;;  %v445_v17 = vld [vmem:[%s2295_s3 + $0x20] sm:$0xff] (!%p365_p9)  ;;  %v447_v18 = vld [vmem:[%s2295_s3 + $0x30] sm:$0xff] (!%p365_p9)  ;;  %s1913_s18 = smov (!%p365_p9), 64   ;;  %s1915_s20 = smov (!%p365_p9), 48   ;;  %vm527_vm2 = vcmask (!%p365_p9), 130048   ;;  %vm603_vm3 = vcmask (!%p365_p9), 64512  }
  0x13   : > { %1739 = vmatprep.subr.bf16.mxu0 (!%p365_p9), %v1738_v10  ;;  %v1744_v19 = vpack.c.bf16 (!%p365_p9), %v447_v18, %v445_v17  ;;  %v1583_v24 = vld [vmem:[%s2293_s1] ss:$0 sm:$0xff] (!%p365_p9)  ;;  %1656 = vmatprep.mubr.msk.f32.mxu1 (!%p365_p9), %vm1912_vm1, %v1911_v14  ;;  %s1916_s26 = smov (!%p365_p9), 32   ;;  %s1917_s28 = smov (!%p365_p9), 16   ;;  %vm1198_vm4 = vcmask (!%p365_p9), 392192   ;;  %vm1208_vm5 = vcmask (!%p365_p9), 523264  }
  0x14   : > { %1741 = vmatpush1.bf16.msra.mxu0 (!%p365_p9), %v1740_v15  ;;  %v1584_v26 = vld [vmem:[%s2294_s2] ss:$0 sm:$0xff] (!%p365_p9)  ;;  %s1918_s29 = smov (!%p365_p9), 96  }
  0x15   : > { %1743 = vmatprep.subr.bf16.mxu0 (!%p365_p9), %v1742_v16 }
  0x18   : > { %s406_s15 = scalar_select %p405_p10, %s2008_s25, 1  ;;  %1745 = vmatpush1.bf16.msra.mxu0 %v1744_v19 }
  0x19   : > { %1649 = vmatprep.subr.mxu0 %v1911_v14 }
  0x1a   : > { %s1582_s16 = sshll.u32 %s406_s15, 3  ;;  %s1919_s15 = smov 80  }
  0x1b   : > { %s408_s19 = scalar_lea.vmem %s2309_s0, %s1582_s16  ;;  %s1607_s0 = sshll.u32 %s2008_s25, 7 }
  0x1c   : > { %v2040_v0 = vld [vmem:[%s408_s19] sm:$0xff]  ;;  %s1914_s19 = smov 112  }
  0x1d   : > { %v411_v1 = vsel %vm410_vm0, %v2040_v0, 0.0 }
  0x1e   : > { %412 = vadd.xlane.f32.xlu0 %v411_v1 }
  0xab   : > { %v413_v2 = vpop.xlane.xlu0 %412 }
  0xac   : > { %v415_v3 = vmul.f32 0.03125, %v413_v2 }
  0xae   : > { %v416_v4 = vsub.f32 %v2040_v0, %v415_v3 }
  0xb0   : > { %v417_v5 = vmul.f32 %v416_v4, %v416_v4 }
  0xb2   : > { %v418_v6 = vsel %vm410_vm0, %v417_v5, 0.0 }
  0xb3   : > { %419 = vadd.xlane.f32.xlu0 %v418_v6 }
 0x140   : > { %v420_v20 = vpop.xlane.xlu0 %419 }
 0x141   : > { %v421_v21 = vmul.f32 0.03125, %v420_v20 }
 0x143   : > { %v422_v22 = vadd.f32 1e-05, %v421_v21 }
 0x145   : > { %1825 = vrsqrt.f32 %v422_v22 }
 0x14f   : > { %v1826_v23 = vpop.eup %1825 }
 0x150   : > { %v424_v25 = vmul.f32 %v1826_v23, %v416_v4 }
 0x152   : > { %v432_v27 = vmul.f32 %v1583_v24, %v424_v25  ;;  %v1200_v24 = vld [vmem:[%s2296_s4] sm:$0xff]  ;;  %v1201_v25 = vld [vmem:[%s2296_s4 + $0x8] sm:$0xff] }
 0x154   : > { %v440_v28 = vadd.f32 %v1584_v26, %v432_v27  ;;  %v1920_v26 = vmov 0.0|0.0   ;;  %v1747_v27 = vpack.c.bf16 %v1201_v25, %v1200_v24  ;;  %v1602_v25 = vld [vmem:[%s2301_s9] ss:$0 sm:$0xff] }
 0x156   : > { %1585 = vmatmul.mubr.msk.f32.vlgmr.msra.gmra.mrb[0].mxu0 %vm410_vm0, %v440_v28  ;;  %v1202_v28 = vld [vmem:[%s2296_s4 + $0x10] sm:$0xff] }
 0x157   : > { %1651 = vmatprep.mubr.msk.f32.mxu0 %vm1912_vm1, %v1911_v14 }
 0x229   : > { %v518_v29 = vpop.f32.mrb[0].mxu0 }
 0x22a   : > { %525 = vrot.lane.b32.xlu1 %v518_v29, %s1913_s18  ;;  %v2084_v30 = vpop.f32.mrb[1].mxu0  ;;  %v523_v31 = vmul.f32 0.25, %v518_v29 }
 0x22b   : > { %1655 = vmatpush3.msra.mxu1 %v2084_v30 }
 0x22c   : > { %688 = vrot.lane.b32.xlu0 %v523_v31, %s1914_s19  ;;  %1664 = vmatprep.subr.mxu1 %v1911_v14 }
 0x22e   : > { %690 = vrot.lane.b32.xlu1 %v518_v29, %s1915_s20 }
 0x232   : > { %856 = vrot.lane.b32.xlu1 %v518_v29, %s1916_s26 }
 0x236   : > { %1021 = vrot.lane.b32.xlu1 %v518_v29, %s1917_s28  ;;  %v1203_v29 = vld [vmem:[%s2296_s4 + $0x18] sm:$0xff] }
 0x23a   : > { %854 = vrot.lane.b32.xlu1 %v523_v31, %s1918_s29 }
 0x23e   : > { %1019 = vrot.lane.b32.xlu1 %v523_v31, %s1919_s15 }
 0x29c   : > { %v526_v32 = vpop.permute.xlu1 %525 }
 0x29d   : > { %1650 = vmatpush3.xpose.msk.msra.mxu0 %vm527_vm2, %v526_v32  ;;  %v1205_v32 = vld [vmem:[%s2296_s4 + $0x28] sm:$0xff] }
 0x29e   : > { %1659 = vmatprep.subr.mxu0 %v1911_v14  ;;  %v689_v34 = vpop.permute.xlu0 %688 }
 0x2a0   : > { %v691_v33 = vpop.permute.xlu1 %690  ;;  %1652 = vmatmul.mubr.msk.f32.vlgmr.msra.gmra.mrb[2].mxu0 %vm527_vm2, %v523_v31  ;;  %v1750_v31 = vpack.c.bf16 %v1203_v29, %v1202_v28 }
 0x2a1   : > { %1660 = vmatpush3.xpose.msk.msra.mxu0 %vm527_vm2, %v691_v33  ;;  %1661 = vmatprep.mubr.msk.f32.mxu0 %vm1912_vm1, %v1911_v14 }
 0x2a2   : > { %1669 = vmatprep.subr.mxu0 %v1911_v14 }
 0x2a4   : > { %v857_v35 = vpop.permute.xlu1 %856  ;;  %1662 = vmatmul.mubr.msk.f32.vlgmr.msra.gmra.mrb[4].mxu0 %vm527_vm2, %v689_v34 }
 0x2a5   : > { %1670 = vmatpush3.xpose.msk.msra.mxu0 %vm527_vm2, %v857_v35  ;;  %1671 = vmatprep.mubr.msk.f32.mxu0 %vm1912_vm1, %v1911_v14 }
 0x2a6   : > { %1679 = vmatprep.subr.mxu0 %v1911_v14 }
 0x2a8   : > { %v1022_v36 = vpop.permute.xlu1 %1021 }
 0x2ac   : > { %v855_v37 = vpop.permute.xlu1 %854 }
 0x2ad   : > { %1672 = vmatmul.mubr.msk.f32.vlgmr.msra.gmra.mrb[6].mxu0 %vm527_vm2, %v855_v37  ;;  %v1207_v37 = vld [vmem:[%s2296_s4 + $0x38] sm:$0xff] }
 0x2ae   : > { %1680 = vmatpush3.xpose.msk.msra.mxu0 %vm527_vm2, %v1022_v36  ;;  %1681 = vmatprep.mubr.msk.f32.mxu0 %vm1912_vm1, %v1911_v14  ;;  %v1206_v36 = vld [vmem:[%s2296_s4 + $0x30] sm:$0xff] }
 0x2af   : > { %1746 = vmatprep.subr.bf16.mxu0 %v1920_v26 }
 0x2b0   : > { %v1020_v38 = vpop.permute.xlu1 %1019 }
 0x2b1   : > { %1682 = vmatmul.mubr.msk.f32.vlgmr.msra.gmra.mrb[8].mxu0 %vm527_vm2, %v1020_v38  ;;  %v1756_v38 = vpack.c.bf16 %v1207_v37, %v1206_v36 }
 0x2b2   : > { %1705 = vmatprep.mubr.msk.f32.mxu0 %vm1912_vm1, %v1911_v14  ;;  %1748 = vmatpush3.bf16.msra.mxu0 %v1747_v27 }
 0x2b3   : > { %1749 = vmatprep.subr.bf16.mxu0 %v1920_v26 }
 0x2b6   : > { %1751 = vmatpush3.bf16.msra.mxu0 %v1750_v31 }
 0x2b7   : > { %1752 = vmatprep.subr.bf16.mxu0 %v1920_v26 }
 0x373   : > { %v599_v39 = vpop.f32.mrb[2].mxu0 }
 0x374   : > { %v1653_v40 = vpop.f32.mrb[3].mxu0  ;;  %v604_v41 = vsel %vm603_vm3, %v599_v39, -inf }
 0x375   : > { %605 = vmax.xlane.f32.xlu1 %v604_v41 }
 0x377   : > { %v762_v42 = vpop.f32.mrb[4].mxu0 }
 0x378   : > { %v1663_v43 = vpop.f32.mrb[5].mxu0  ;;  %v766_v44 = vsel %vm603_vm3, %v762_v42, -inf }
 0x379   : > { %767 = vmax.xlane.f32.xlu0 %v766_v44 }
 0x380   : > { %v928_v45 = vpop.f32.mrb[6].mxu0 }
 0x381   : > { %v1673_v46 = vpop.f32.mrb[7].mxu0  ;;  %v932_v47 = vsel %vm603_vm3, %v928_v45, -inf }
 0x382   : > { %933 = vmax.xlane.f32.xlu1 %v932_v47 }
 0x384   : > { %v1093_v48 = vpop.f32.mrb[8].mxu0 }
 0x385   : > { %v1683_v49 = vpop.f32.mrb[9].mxu0  ;;  %v1097_v50 = vsel %vm603_vm3, %v1093_v48, -inf }
 0x386   : > { %1098 = vmax.xlane.f32.xlu0 %v1097_v50 }
 0x393   : > { %778 = vrot.lane.b32.xlu1 %v2084_v30, %s1914_s19  ;;  %s2249_s19 = scalar_lea.hbm %s2304_s12, %s1607_s0 }
 0x402   : > { %v606_v51 = vpop.xlane.xlu1 %605 }
 0x403   : > { %v607_v52 = vsub.f32 %v599_v39, %v606_v51 }
 0x405   : > { %v608_v53 = vmul.f32 1.442695, %v607_v52  ;;  %v1599_v52 = vld [vmem:[%s2297_s5] ss:$0 sm:$0xff] }
 0x406   : > { %v768_v54 = vpop.xlane.xlu0 %767 }
 0x407   : > { %1827 = vpow2.f32 %v608_v53  ;;  %v769_v55 = vsub.f32 %v762_v42, %v768_v54 }
 0x409   : > { %v770_v56 = vmul.f32 1.442695, %v769_v55 }
 0x40b   : > { %1829 = vpow2.f32 %v770_v56 }
 0x40f   : > { %v934_v57 = vpop.xlane.xlu1 %933 }
 0x410   : > { %v935_v58 = vsub.f32 %v928_v45, %v934_v57 }
 0x411   : > { %v1828_v59 = vpop.eup %1827 }
 0x412   : > { %v936_v60 = vmul.f32 1.442695, %v935_v58  ;;  %v610_v61 = vsel %vm603_vm3, %v1828_v59, 0.0 }
 0x413   : > { %611 = vadd.xlane.f32.xlu1 %v610_v61  ;;  %v1099_v62 = vpop.xlane.xlu0 %1098  ;;  %v779_v8 = vpop.permute.xlu1 %778 }
 0x414   : > { %1831 = vpow2.f32 %v936_v60  ;;  %v1100_v63 = vsub.f32 %v1093_v48, %v1099_v62  ;;  %v1320_v62 = vld [vmem:[%s2300_s8] sm:$0xff] }
 0x415   : > { %v1830_v1 = vpop.eup %1829 }
 0x416   : > { %v1101_v2 = vmul.f32 1.442695, %v1100_v63  ;;  %v772_v3 = vsel %vm603_vm3, %v1830_v1, 0.0 }
 0x417   : > { %773 = vadd.xlane.f32.xlu0 %v772_v3 }
 0x418   : > { %1833 = vpow2.f32 %v1101_v2  ;;  %v1323_v2 = vld [vmem:[%s2300_s8 + $0x18] sm:$0xff] }
 0x41e   : > { %v1832_v4 = vpop.eup %1831 }
 0x41f   : > { %v938_v5 = vsel %vm603_vm3, %v1832_v4, 0.0 }
 0x420   : > { %939 = vadd.xlane.f32.xlu1 %v938_v5 }
 0x422   : > { %v1834_v6 = vpop.eup %1833 }
 0x423   : > { %v1103_v7 = vsel %vm603_vm3, %v1834_v6, 0.0 }
 0x424   : > { %1104 = vadd.xlane.f32.xlu0 %v1103_v7 }
 0x431   : > { %1108 = vrot.lane.b32.xlu1 %v2084_v30, %s1919_s15  ;;  %s402_s15 = sand.u32 1, %s1901_s22  }
 0x43a   : > { %943 = vrot.lane.b32.xlu0 %v2084_v30, %s1918_s29  ;;  %v1204_v30 = vld [vmem:[%s2296_s4 + $0x20] sm:$0xff]  ;;  %s1505_s29 = scalar_lea.sflag [#allocation3], %s402_s15 }
 0x43b   : > { %v1753_v33 = vpack.c.bf16 %v1205_v32, %v1204_v30 }
 0x43d   : > { %1754 = vmatpush3.bf16.msra.mxu0 %v1753_v33 }
 0x43e   : > { %1755 = vmatprep.subr.bf16.mxu0 %v1920_v26 }
 0x441   : > { %1757 = vmatpush3.bf16.msra.mxu0 %v1756_v38 }
 0x4a0   : > { %v612_v9 = vpop.xlane.xlu1 %611 }
 0x4a1   : > { %1835 = vrcp.f32 %v612_v9 }
 0x4a4   : > { %v774_v10 = vpop.xlane.xlu0 %773 }
 0x4a5   : > { %1837 = vrcp.f32 %v774_v10  ;;  %v1601_v10 = vld [vmem:[%s2299_s7] ss:$0 sm:$0xff] }
 0x4ab   : > { %v1836_v11 = vpop.eup %1835 }
 0x4ac   : > { %v614_v12 = vmul.f32 %v1836_v11, %v1828_v59 }
 0x4ad   : > { %v940_v13 = vpop.xlane.xlu1 %939 }
 0x4ae   : > { %1839 = vrcp.f32 %v940_v13  ;;  %1657 = vmatmul.mubr.msk.f32.vlgmr.msra.gmra.mrb[0].mxu1 %vm603_vm3, %v614_v12  ;;  %v1413_v13 = vld [vmem:[%s2302_s10] sm:$0xff] }
 0x4af   : > { %v1838_v15 = vpop.eup %1837  ;;  %1665 = vmatpush3.msra.mxu1 %v779_v8  ;;  %1666 = vmatprep.mubr.msk.f32.mxu1 %vm1912_vm1, %v1911_v14  ;;  %v1600_v8 = vld [vmem:[%s2298_s6] ss:$0 sm:$0xff] }
 0x4b0   : > { %v776_v16 = vmul.f32 %v1838_v15, %v1830_v1  ;;  %1674 = vmatprep.subr.mxu1 %v1911_v14  ;;  %v1322_v1 = vld [vmem:[%s2300_s8 + $0x10] sm:$0xff]  ;;  %v1414_v15 = vld [vmem:[%s2302_s10 + $0x8] sm:$0xff] }
 0x4b1   : > { %v1105_v17 = vpop.xlane.xlu0 %1104  ;;  %v1109_v21 = vpop.permute.xlu1 %1108  ;;  %v1762_v3 = vpack.c.bf16 %v1323_v2, %v1322_v1 }
 0x4b2   : > { %1841 = vrcp.f32 %v1105_v17  ;;  %1667 = vmatmul.mubr.msk.f32.vlgmr.msra.gmra.mrb[2].mxu1 %vm603_vm3, %v776_v16  ;;  %v1765_v16 = vpack.c.bf16 %v1414_v15, %v1413_v13  ;;  %v1415_v17 = vld [vmem:[%s2302_s10 + $0x10] sm:$0xff] }
 0x4b3   : > { %1676 = vmatprep.mubr.msk.f32.mxu1 %vm1912_vm1, %v1911_v14 }
 0x4b5   : > { %v944_v18 = vpop.permute.xlu0 %943 }
 0x4b6   : > { %1675 = vmatpush3.msra.mxu1 %v944_v18  ;;  %v1416_v18 = vld [vmem:[%s2302_s10 + $0x18] sm:$0xff] }
 0x4b7   : > { %1684 = vmatprep.subr.mxu1 %v1911_v14 }
 0x4b8   : > { %v1840_v19 = vpop.eup %1839 }
 0x4b9   : > { %v942_v20 = vmul.f32 %v1840_v19, %v1832_v4  ;;  %v1768_v19 = vpack.c.bf16 %v1416_v18, %v1415_v17 }
 0x4bb   : > { %1677 = vmatmul.mubr.msk.f32.vlgmr.msra.gmra.mrb[4].mxu1 %vm603_vm3, %v942_v20  ;;  %v1418_v20 = vld [vmem:[%s2302_s10 + $0x28] sm:$0xff] }
 0x4bc   : > { %v1842_v22 = vpop.eup %1841  ;;  %1685 = vmatpush3.msra.mxu1 %v1109_v21  ;;  %1686 = vmatprep.mubr.msk.f32.mxu1 %vm1912_vm1, %v1911_v14 }
 0x4bd   : > { %v1107_v23 = vmul.f32 %v1842_v22, %v1834_v6  ;;  %1758 = vmatprep.subr.bf16.mxu1 %v1920_v26  ;;  %v1419_v22 = vld [vmem:[%s2302_s10 + $0x30] sm:$0xff] }
 0x4bf   : > { %1687 = vmatmul.mubr.msk.f32.vlgmr.msra.gmra.mrb[6].mxu1 %vm603_vm3, %v1107_v23  ;;  %v1420_v23 = vld [vmem:[%s2302_s10 + $0x38] sm:$0xff] }
 0x4c0   : > { %1716 = vmatprep.mubr.msk.f32.mxu1 %vm1912_vm1, %v1911_v14  ;;  %v1774_v24 = vpack.c.bf16 %v1420_v23, %v1419_v22 }
 0x581   : > { %v684_v34 = vpop.f32.mrb[0].mxu1 }
 0x582   : > { %v1658_v35 = vpop.f32.mrb[1].mxu1 }
 0x585   : > { %v850_v39 = vpop.f32.mrb[2].mxu1 }
 0x586   : > { %1185 = vrot.lane.b32.xlu1 %v850_v39, %s1917_s28  ;;  %v1668_v40 = vpop.f32.mrb[3].mxu1  ;;  %s1581_s28 = sshll.u32 %s402_s15, 3  ;;  %v1605_v39 = vld [vmem:[%s2303_s11] ss:$0 sm:$0xff] }
 0x587   : > { %s404_s30 = scalar_lea.vmem [#allocation2], %s1581_s28  ;;  %s1921_s28 = smov [#allocation2]  }
 0x588   : > { %s1518_s16 = sshll.u32 %s404_s30, 4  ;;  %s2251_s16 = int_to_ptr.vmem [resolvable:$true] %s1518_s16 }
 0x589   : > { %s1847_s25 = scalar_lea.vmem %s2251_s16, 128 }
 0x58a   : > { %p1848_p11 = scmp.ne.s32.totalorder %s2251_s16, %s1847_s25 }
 0x58c   : > { %p1849_p12 = pnand %p1848_p11, %p2025_p5 }
 0x58e   : > { %v1015_v41 = vpop.f32.mrb[4].mxu1  ;;  %p1850_p13 = pneg %p1849_p12 }
 0x58f   : > { %1189 = vrot.lane.b32.xlu0 %v1015_v41, %s1916_s26  ;;  %v1678_v42 = vpop.f32.mrb[5].mxu1  ;;  %s1851_s26 = sshll.u32 %s1921_s28, 4  ;;  %s1852_s26 = int_to_ptr.vmem [resolvable:$false] %s1851_s26 }
 0x590   : > { %p1854_p0 = scmp.lt.s32.totalorder %s2251_s16, %s1852_s26 }
 0x592   : > { %v1180_v43 = vpop.f32.mrb[6].mxu1 }
 0x593   : > { %1193 = vrot.lane.b32.xlu1 %v1180_v43, %s1915_s20  ;;  %v1688_v44 = vpop.f32.mrb[7].mxu1  ;;  %s1853_s20 = scalar_lea.vmem %s1852_s26, 256 }
 0x594   : > { %p1855_p1 = scmp.lt.s32.totalorder %s1853_s20, %s1847_s25 }
 0x596   : > { %p1856_p2 = por %p1855_p1, %p1854_p0 }
 0x598   : > { %p1857_p3 = pnand %p1856_p2, %p1850_p13 }
 0x5f8   : > { %v1186_v45 = vpop.permute.xlu1 %1185 }
 0x5f9   : > { %v1196_v47 = vsel %vm527_vm2, %v684_v34, %v1186_v45 }
 0x601   : > { %v1190_v46 = vpop.permute.xlu0 %1189 }
 0x602   : > { %v1197_v48 = vsel %vm410_vm0, %v1196_v47, %v1190_v46 }
 0x605   : > { %v1194_v49 = vpop.permute.xlu1 %1193 }
 0x606   : > { %v1199_v50 = vsel %vm1198_vm4, %v1197_v48, %v1194_v49 }
 0x607   : > { %1706 = vmatmul.mubr.msk.f32.vlgmr.msra.gmra.mrb[10].mxu0 %vm1208_vm5, %v1199_v50 }
 0x6da   : > { %v1278_v51 = vpop.f32.mrb[10].mxu0 }
 0x6db   : > { %v1282_v53 = vadd.f32 %v1278_v51, %v2040_v0  ;;  %v1707_v54 = vpop.f32.mrb[11].mxu0  ;;  %v1321_v0 = vld [vmem:[%s2300_s8 + $0x8] sm:$0xff] }
 0x6dc   : > { %v1759_v63 = vpack.c.bf16 %v1321_v0, %v1320_v62 }
 0x6dd   : > { %v2180_v55 = vadd.f32 %v1599_v52, %v1282_v53 }
 0x6de   : > { %1760 = vmatpush3.bf16.msra.mxu1 %v1759_v63 }
 0x6df   : > { %v1291_v56 = vsel %vm410_vm0, %v2180_v55, 0.0  ;;  %1761 = vmatprep.subr.bf16.mxu1 %v1920_v26 }
 0x6e0   : > { %1292 = vadd.xlane.f32.xlu0 %v1291_v56 }
 0x6e2   : > { %1763 = vmatpush3.bf16.msra.mxu1 %v1762_v3 }
 0x6e3   : > { %1764 = vmatprep.subr.bf16.mxu1 %v1920_v26 }
 0x76d   : > { %v1293_v57 = vpop.xlane.xlu0 %1292 }
 0x76e   : > { %v1294_v58 = vmul.f32 0.03125, %v1293_v57 }
 0x770   : > { %v1295_v59 = vsub.f32 %v2180_v55, %v1294_v58 }
 0x772   : > { %v1296_v60 = vmul.f32 %v1295_v59, %v1295_v59 }
 0x774   : > { %v1297_v61 = vsel %vm410_vm0, %v1296_v60, 0.0 }
 0x775   : > { %1298 = vadd.xlane.f32.xlu1 %v1297_v61 }
 0x802   : > { %v1299_v4 = vpop.xlane.xlu1 %1298 }
 0x803   : > { %v1300_v5 = vmul.f32 0.03125, %v1299_v4 }
 0x805   : > { %v1301_v6 = vadd.f32 1e-05, %v1300_v5 }
 0x807   : > { %1843 = vrsqrt.f32 %v1301_v6 }
 0x811   : > { %v1844_v7 = vpop.eup %1843 }
 0x812   : > { %v1303_v9 = vmul.f32 %v1844_v7, %v1295_v59 }
 0x814   : > { %v1311_v11 = vmul.f32 %v1600_v8, %v1303_v9 }
 0x816   : > { %v1319_v12 = vadd.f32 %v1601_v10, %v1311_v11 }
 0x818   : > { %1717 = vmatmul.mubr.msk.f32.vlgmr.msra.gmra.mrb[8].mxu1 %vm410_vm0, %v1319_v12 }
 0x819   : > { %1735 = vmatprep.mubr.msk.f32.mxu1 %vm1912_vm1, %v1911_v14  ;;  %1766 = vmatpush3.bf16.msra.mxu1 %v1765_v16  ;;  %v1417_v14 = vld [vmem:[%s2302_s10 + $0x20] sm:$0xff] }
 0x81a   : > { %1767 = vmatprep.subr.bf16.mxu1 %v1920_v26  ;;  %v1771_v21 = vpack.c.bf16 %v1418_v20, %v1417_v14 }
 0x81d   : > { %1769 = vmatpush3.bf16.msra.mxu1 %v1768_v19 }
 0x81e   : > { %1770 = vmatprep.subr.bf16.mxu1 %v1920_v26 }
 0x821   : > { %1772 = vmatpush3.bf16.msra.mxu1 %v1771_v21 }
 0x822   : > { %1773 = vmatprep.subr.bf16.mxu1 %v1920_v26 }
 0x825   : > { %1775 = vmatpush3.bf16.msra.mxu1 %v1774_v24 }
 0x8eb   : > { %v1400_v27 = vpop.f32.mrb[8].mxu1 }
 0x8ec   : > { %v1401_v28 = vadd.f32 %v1602_v25, %v1400_v27  ;;  %v1718_v29 = vpop.f32.mrb[9].mxu1 }
 0x8ee   : > { %v1405_v30 = vmul.f32 0.044715, %v1401_v28  ;;  %v1404_v36 = vmul.f32 0.5, %v1401_v28 }
 0x8f0   : > { %v1406_v31 = vmul.f32 %v1405_v30, %v1401_v28 }
 0x8f2   : > { %v1407_v32 = vmul.f32 %v1406_v31, %v1401_v28 }
 0x8f4   : > { %v1408_v33 = vadd.f32 %v1407_v32, %v1401_v28 }
 0x8f6   : > { %v1409_v34 = vmul.f32 0.7978846, %v1408_v33 }
 0x8f8   : > { %1845 = vtanh.f32 %v1409_v34 }
 0x902   : > { %v1846_v35 = vpop.eup %1845 }
 0x903   : > { %v1411_v37 = vadd.f32 1.0, %v1846_v35 }
 0x905   : > { %v1412_v26 = vmul.f32 %v1411_v37, %v1404_v36 }
 0x907   : > { %1736 = vmatmul.mubr.msk.f32.vlgmr.msra.gmra.mrb[10].mxu1 %vm1208_vm5, %v1412_v26 }
 0x9da   : > { %v1490_v38 = vpop.f32.mrb[10].mxu1 }
 0x9db   : > { %v1494_v40 = vadd.f32 %v1490_v38, %v2180_v55  ;;  %v1737_v41 = vpop.f32.mrb[11].mxu1 }
 0x9dd   : > { %v1502_v42 = vadd.f32 %v1605_v39, %v1494_v40 }
 0x9df   : > { %1503 = vst.msk [vmem:[%s404_s30] sm:$0xff] %vm410_vm0, %v1502_v42 }
 0x9e0   : > { %1860 = shalt.err (!%p1857_p3)
}
 0x9e1   : > { %s1861_s15 = scalar_lea.hbm %s2249_s19, 128  ;;  %s1865_s17 = scalar_lea.hbm %s2304_s12, 256 }
 0x9e2   : > { %p1862_p4 = scmp.ne.s32.totalorder %s2249_s19, %s1861_s15  ;;  %p1866_p9 = scmp.lt.u32.totalorder %s2249_s19, %s2304_s12 }
 0x9e3   : > { %p1867_p10 = scmp.lt.u32.totalorder %s1865_s17, %s1861_s15  ;;  %p1869_p12 = scmp.lt.u32.totalorder %s1861_s15, %s2249_s19 }
 0x9e4   : > { %p1863_p7 = pnand %p1862_p4, %p2025_p5 }
 0x9e5   : > { %p1868_p11 = por %p1867_p10, %p1866_p9 }
 0x9e6   : > { %p1864_p8 = pneg %p1863_p7 }
 0x9e7   : > { %p1870_p13 = por %p1869_p12, %p1868_p11 }
 0x9e9   : > { %p1871_p0 = pnand %p1870_p13, %p1864_p8 }
 0x9eb   : > { %1874 = shalt.err (!%p1871_p0)
}
 0x9ec   : > { %1776 = dma.vmem_to_hbm [thread:$0]  (%p2025_p5), %s2251_s16, 128, %s2249_s19, %s1505_s29  }
 0x9ed PF: > { %p1782_p1 = scmp.ge.s32.totalorder %s1909_s24, 2  ;;  %s1530_s25 = sand.u32 1, %s1897_s21  }
 0x9ee   : > { %s1531_s26 = scalar_lea.sflag [#allocation3], %s1530_s25 }
 0x9ef   : > { %p1779_p2 = pnand %p1782_p1, %p2029_p6 }
 0x9f1   : > { %1892 = dma.done.wait (!%p1779_p2), %s1531_s26, 128  }
 0x9f2   : > { %1894 = vsyncadd (!%p1779_p2), %s1531_s26, 4294967168  ;;  %s2310_s20 = sld [smem:[#allocation5_spill]]  ;;  %p22_p3 = scmp.ge.s32.totalorder %s2012_s27, 4  }
 0x9f3   : > { %s2311_s21 = smov %s1901_s22  ;;  %s2312_s22 = smov %s1905_s23 }
 0x9f4   : > { %s2314_s24 = smov %s2012_s27  ;;  %24 = sbr.rel (!%p22_p3) target bundleno = 5 (0x5), region = 103 }
 0x9f8   : > { %s2313_s23 = smov %s2310_s20 }
 0x9fb   :  { %1536 = vsyncpa [#allocation3], 1 }
 0x9fc   :  { %1538 = vsyncpa [#allocation3 + $0x1], 1 }

</bundles_post_ra>
